<compile_context>
chip_gen: v6e
topology: v6e:2x2x1
jax: 0.10.0
libtpu: 0.0.40
codegen_flags: <defaults>
</compile_context>

<pallas_src>
import jax
import jax.numpy as jnp
from jax.experimental import pallas as pl
from jax.experimental.pallas import tpu as pltpu


def mlp_kernel(x_ref, w1_ref, b1_ref, w2_ref, b2_ref, o_ref):
    # fc1: (TB, 640) @ (640, 64) on the MXU, f32 accumulate regardless of the
    # input streaming dtype; bias + ReLU on the VPU.
    h = jnp.dot(x_ref[...], w1_ref[...], preferred_element_type=jnp.float32)
    h = jnp.maximum(h + b1_ref[...], 0.0)
    # fc2: output width is 1 -> skip the degenerate MXU pass; VPU mul + XLU
    # lane reduce (both sit in slots with slack; the kernel is HBM-bound).
    y = jnp.sum(h * w2_ref[...], axis=-1, keepdims=True) + b2_ref[0, 0]
    o_ref[...] = y.astype(o_ref.dtype)


def _round_up(n, m):
    return (n + m - 1) // m * m


def _vmem_capacity_bytes():
    # Trace-time hardware query; fall back to the most conservative value
    # (v7x per-TC VMEM) if the query is unavailable.
    try:
        return int(pltpu.get_tpu_info().vmem_capacity_bytes)
    except Exception:
        return 64 * 1024 * 1024


def simple_cpg_predictor(x, w1, b1, w2, b2, *, tile_b=None, fc1_dtype=None):
    """x: (B, 5, 128); w1: (640, 64), b1: (64,), w2: (64, 1), b2: (1,).

    Weights are pre-transposed to (in_features, out_features).
    """
    B = x.shape[0]
    x2d = x.reshape(B, -1)                       # glue: flatten (view)
    in_size = x2d.shape[1]
    hidden = w1.shape[1]
    out_size = w2.shape[1]
    assert out_size == 1, "VPU-reduce fc2 path assumes output_size == 1"

    if fc1_dtype is not None and x2d.dtype != fc1_dtype:
        # TODO(synk): for the HBM-bandwidth win this cast should happen
        # upstream (x stored/produced as bf16); casting here adds a separate
        # f32-read/bf16-write pass outside the kernel.
        x2d = x2d.astype(fc1_dtype)
    w1c = w1.astype(x2d.dtype)                   # tiny one-off cast of weights
    out_dtype = jnp.promote_types(x2d.dtype, w2.dtype)

    # --- Generation-aware tile / VMEM budget ------------------------------
    vmem_cap = _vmem_capacity_bytes()
    small_vmem = vmem_cap < 96 * 1024 * 1024     # v7x: 64 MiB per TC
    if tile_b is None:
        tile_b = 4096 if small_vmem else 8192    # v7x cap vs v5e/v6e big tiles
    vmem_limit = min(int(0.75 * vmem_cap), 100 * 1024 * 1024)

    # Batch tile: multiple of the sublane packing for the streaming dtype
    # (8 for f32, 16 for bf16), and shrunk so the grid has >= 4 steps when the
    # batch allows it (feeds both v7x TensorCores, enables pipelining).
    sub = 32 // max(x2d.dtype.itemsize, 1)
    tb = min(_round_up(tile_b, sub), _round_up(pl.cdiv(B, 4), sub))
    tb = max(tb, sub)
    grid = (pl.cdiv(B, tb),)                     # ragged last block, no pad

    b1_2d = b1.reshape(1, hidden).astype(jnp.float32)
    w2_row = w2.reshape(out_size, hidden).astype(jnp.float32)  # (1, 64) row
    b2_2d = b2.reshape(1, 1).astype(jnp.float32)               # scalar in SMEM

    cost = pl.CostEstimate(
        flops=2 * B * in_size * hidden + 3 * B * hidden,
        transcendentals=0,
        bytes_accessed=(x2d.size * x2d.dtype.itemsize
                        + w1c.size * w1c.dtype.itemsize
                        + 4 * (hidden + hidden + 1 + B * out_size)),
    )

    out = pl.pallas_call(
        mlp_kernel,
        out_shape=jax.ShapeDtypeStruct((B, out_size), out_dtype),
        grid_spec=pltpu.PrefetchScalarGridSpec(
            num_scalar_prefetch=0,
            grid=grid,
            in_specs=[
                # x tile moves with the grid (auto double-buffered).
                pl.BlockSpec((tb, in_size), lambda i: (i, 0)),
                # Weights/biases: constant block index -> resident in VMEM.
                pl.BlockSpec((in_size, hidden), lambda i: (0, 0)),
                pl.BlockSpec((1, hidden), lambda i: (0, 0)),
                pl.BlockSpec((1, hidden), lambda i: (0, 0)),
                # b2 scalar lives in SMEM.
                pl.BlockSpec(memory_space=pltpu.MemorySpace.SMEM),
            ],
            out_specs=pl.BlockSpec((tb, out_size), lambda i: (i, 0)),
        ),
        compiler_params=pltpu.CompilerParams(
            dimension_semantics=("parallel",),
            vmem_limit_bytes=vmem_limit,
        ),
        cost_estimate=cost,
    )(x2d, w1c, b1_2d, w2_row, b2_2d)

    return out


def reference(x, w1, b1, w2, b2):
    x2d = x.astype(jnp.float32).reshape(x.shape[0], -1)
    h = jnp.maximum(x2d @ w1 + b1, 0.0)
    return h @ w2 + b2


if __name__ == "__main__":
    input_size = 5 * 128
    hidden_size = 64
    output_size = 1

    key = jax.random.PRNGKey(0)
    kx, kw1, kb1, kw2, kb2 = jax.random.split(key, 5)

    # Deterministic parameter init (uniform like PyTorch's default Linear init)
    bound1 = 1.0 / (input_size ** 0.5)
    w1 = jax.random.uniform(kw1, (input_size, hidden_size),
                            minval=-bound1, maxval=bound1, dtype=jnp.float32)
    b1 = jax.random.uniform(kb1, (hidden_size,),
                            minval=-bound1, maxval=bound1, dtype=jnp.float32)
    bound2 = 1.0 / (hidden_size ** 0.5)
    w2 = jax.random.uniform(kw2, (hidden_size, output_size),
                            minval=-bound2, maxval=bound2, dtype=jnp.float32)
    b2 = jax.random.uniform(kb2, (output_size,),
                            minval=-bound2, maxval=bound2, dtype=jnp.float32)

    # (1) Small single-tile f32 path: B=8 -> tb=8, exact block.
    B = 8
    x = jax.random.normal(kx, (B, 5, 128), dtype=jnp.float32)
    y = jax.block_until_ready(simple_cpg_predictor(x, w1, b1, w2, b2))
    y_ref = reference(x, w1, b1, w2, b2)
    assert y.shape == (B, output_size), y.shape
    assert jnp.allclose(y, y_ref, atol=1e-4, rtol=1e-4), "mismatch (B=8, f32)"

    # (2) Tiled + ragged last block (no pad copy): B=40, tb=16 -> grid of 3.
    B2 = 40
    x2 = jax.random.normal(kx, (B2, 5, 128), dtype=jnp.float32)
    y2 = jax.block_until_ready(
        simple_cpg_predictor(x2, w1, b1, w2, b2, tile_b=16))
    y2_ref = reference(x2, w1, b1, w2, b2)
    assert y2.shape == (B2, output_size), y2.shape
    assert jnp.allclose(y2, y2_ref, atol=1e-4, rtol=1e-4), "mismatch (B=40, f32)"

    # (3) bf16 x stream (produced upstream), f32 MXU accumulate inside the
    #     kernel; looser tolerance for the bf16 inputs.
    x3 = x2.astype(jnp.bfloat16)
    y3 = jax.block_until_ready(simple_cpg_predictor(x3, w1, b1, w2, b2))
    assert y3.shape == (B2, output_size), y3.shape
    assert jnp.allclose(y3.astype(jnp.float32), y2_ref,
                        atol=3e-2, rtol=3e-2), "mismatch (B=40, bf16)"

    print("KERNEL_OK")
</pallas_src>

<mosaic_0001>
module attributes {stable_mosaic.version = 11 : i64} {
  func.func @mlp_kernel(%arg0: i32, %arg1: memref<8x640xf32, #tpu.memory_space<vmem>>, %arg2: memref<640x64xf32, #tpu.memory_space<vmem>>, %arg3: memref<1x64xf32, #tpu.memory_space<vmem>>, %arg4: memref<1x64xf32, #tpu.memory_space<vmem>>, %arg5: memref<1x1xf32, #tpu.memory_space<smem>>, %arg6: memref<8x1xf32, #tpu.memory_space<vmem>>) attributes {dimension_semantics = [#tpu.dimension_semantics<parallel>], iteration_bounds = array<i64: 1>, scalar_prefetch = 0 : i64, scratch_operands = 0 : i64, tpu.core_type = #tpu.core_type<tc>, window_params = [{transform_indices = @transform_0, window_bounds = array<i64: 8, 640>}, {pipeline_mode = #tpu.pipeline_mode<synchronous>, transform_indices = @transform_1, window_bounds = array<i64: 640, 64>}, {pipeline_mode = #tpu.pipeline_mode<synchronous>, transform_indices = @transform_2, window_bounds = array<i64: 1, 64>}, {pipeline_mode = #tpu.pipeline_mode<synchronous>, transform_indices = @transform_3, window_bounds = array<i64: 1, 64>}, {transform_indices = @transform_4, window_bounds = array<i64: 1, 1>}, {transform_indices = @transform_5, window_bounds = array<i64: 8, 1>}]} {
    %c0 = arith.constant 0 : index
    %c0_0 = arith.constant 0 : index
    %0 = vector.load %arg1[%c0, %c0_0] : memref<8x640xf32, #tpu.memory_space<vmem>>, vector<8x640xf32>
    %c0_1 = arith.constant 0 : index
    %c0_2 = arith.constant 0 : index
    %1 = vector.load %arg2[%c0_1, %c0_2] : memref<640x64xf32, #tpu.memory_space<vmem>>, vector<640x64xf32>
    %cst = arith.constant dense<0.000000e+00> : vector<8x64xf32>
    %2 = tpu.matmul %0, %1, %cst {dimension_numbers = #tpu.dot_dimension_numbers<[1], [0], [0], [1], [0, 0, 1, 1], [], []>} : vector<8x640xf32>, vector<640x64xf32>, vector<8x64xf32> -> vector<8x64xf32>
    %c0_3 = arith.constant 0 : index
    %c0_4 = arith.constant 0 : index
    %3 = vector.load %arg3[%c0_3, %c0_4] : memref<1x64xf32, #tpu.memory_space<vmem>>, vector<1x64xf32>
    %4 = vector.broadcast %3 : vector<1x64xf32> to vector<8x64xf32>
    %5 = arith.addf %2, %4 : vector<8x64xf32>
    %cst_5 = arith.constant 0.000000e+00 : f32
    %6 = vector.broadcast %cst_5 : f32 to vector<8x64xf32>
    %7 = arith.maximumf %5, %6 : vector<8x64xf32>
    %c0_6 = arith.constant 0 : index
    %c0_7 = arith.constant 0 : index
    %8 = vector.load %arg4[%c0_6, %c0_7] : memref<1x64xf32, #tpu.memory_space<vmem>>, vector<1x64xf32>
    %9 = vector.broadcast %8 : vector<1x64xf32> to vector<8x64xf32>
    %10 = arith.mulf %7, %9 : vector<8x64xf32>
    %cst_8 = arith.constant dense<0.000000e+00> : vector<8xf32>
    %11 = vector.multi_reduction <add>, %10, %cst_8 [1] : vector<8x64xf32> to vector<8xf32>
    %12 = vector.shape_cast %11 : vector<8xf32> to vector<8x1xf32>
    %c0_9 = arith.constant 0 : index
    %c0_10 = arith.constant 0 : index
    %13 = memref.load %arg5[%c0_9, %c0_10] : memref<1x1xf32, #tpu.memory_space<smem>>
    %14 = vector.broadcast %13 : f32 to vector<8x1xf32>
    %15 = arith.addf %12, %14 : vector<8x1xf32>
    %c0_11 = arith.constant 0 : index
    %c0_12 = arith.constant 0 : index
    %16 = vector.load %arg6[%c0_11, %c0_12] : memref<8x1xf32, #tpu.memory_space<vmem>>, vector<8x1xf32>
    tpu.vector_store %arg6[%c0_11, %c0_12], %15 {strides = array<i32>} : memref<8x1xf32, #tpu.memory_space<vmem>>, vector<8x1xf32>,
    return
  }
  func.func @transform_0(%arg0: i32) -> (i32, i32) {
    %c0_i32 = arith.constant 0 : i32
    %c0_i32_0 = arith.constant 0 : i32
    return %arg0, %c0_i32 : i32, i32
  }
  func.func @transform_1(%arg0: i32) -> (i32, i32) {
    %c0_i32 = arith.constant 0 : i32
    %c0_i32_0 = arith.constant 0 : i32
    %c0_i32_1 = arith.constant 0 : i32
    return %c0_i32, %c0_i32_0 : i32, i32
  }
  func.func @transform_2(%arg0: i32) -> (i32, i32) {
    %c0_i32 = arith.constant 0 : i32
    %c0_i32_0 = arith.constant 0 : i32
    %c0_i32_1 = arith.constant 0 : i32
    return %c0_i32, %c0_i32_0 : i32, i32
  }
  func.func @transform_3(%arg0: i32) -> (i32, i32) {
    %c0_i32 = arith.constant 0 : i32
    %c0_i32_0 = arith.constant 0 : i32
    %c0_i32_1 = arith.constant 0 : i32
    return %c0_i32, %c0_i32_0 : i32, i32
  }
  func.func @transform_4(%arg0: i32) -> (i32, i32) {
    %c0_i32 = arith.constant 0 : i32
    %c0_i32_0 = arith.constant 0 : i32
    %c0_i32_1 = arith.constant 0 : i32
    return %c0_i32, %c0_i32_0 : i32, i32
  }
  func.func @transform_5(%arg0: i32) -> (i32, i32) {
    %c0_i32 = arith.constant 0 : i32
    %c0_i32_0 = arith.constant 0 : i32
    return %arg0, %c0_i32 : i32, i32
  }
}

</mosaic_0001>

<bundles_post_ra>
// kernel: tpu_custom_call.1
= control target key start
LH: loop header
LB: loop body
LE: loop exit
PB: predicated region body
PF: predicated region fallthrough
CT: control target
= control target key end

     0   :  { %vm472_vm0 = vmmov 0   ;;  %vm332_vm1 = vcmask 523264   ;;  %vm339_vm2 = vcmask 7168   ;;  %s770_s1 = inlined_call_operand.vmem [shape: f32[640,64], index: 1, kind: input, shape index: {}]   ;;  %s771_s0 = inlined_call_operand.vmem [shape: f32[8,640], index: 0, kind: input, shape index: {}]   ;;  %s772_s2 = inlined_call_operand.vmem [shape: f32[1,64], index: 2, kind: input, shape index: {}]   ;;  %s773_s3 = inlined_call_operand.vmem [shape: f32[1,64], index: 3, kind: input, shape index: {}]   ;;  %s774_s4 = inlined_call_operand.<no memory space> [shape: f32[1,1], index: 4, kind: input, shape index: {}]   ;;  %s775_s5 = inlined_call_operand.vmem [shape: f32[8,1], index: 5, kind: output, shape index: {}]  }
   0x1   :  { %v57_v0 = vld [vmem:[%s770_s1 + $0xf8] sm:$0xff]  ;;  %v56_v2 = vld [vmem:[%s770_s1 + $0xf0] sm:$0xff]  ;;  %v55_v6 = vld [vmem:[%s770_s1 + $0xe8] sm:$0xff] }
   0x2   :  { %v41_v1 = vld [vmem:[%s770_s1 + $0x78] sm:$0xff]  ;;  %347 = vmatprep.subr.mxu0 %v57_v0  ;;  %v40_v4 = vld [vmem:[%s770_s1 + $0x70] sm:$0xff]  ;;  %v39_v8 = vld [vmem:[%s770_s1 + $0x68] sm:$0xff] }
   0x3   :  { %v89_v3 = vld [vmem:[%s770_s1 + $0x1f8] sm:$0xff]  ;;  %348 = vmatpush3.msra.mxu0 %v41_v1  ;;  %v88_v7 = vld [vmem:[%s770_s1 + $0x1f0] sm:$0xff]  ;;  %v87_v10 = vld [vmem:[%s770_s1 + $0x1e8] sm:$0xff] }
   0x4   :  { %v73_v5 = vld [vmem:[%s770_s1 + $0x178] sm:$0xff]  ;;  %382 = vmatprep.subr.mxu1 %v89_v3  ;;  %349 = vmatprep.subr.mxu0 %v56_v2  ;;  %v72_v9 = vld [vmem:[%s770_s1 + $0x170] sm:$0xff]  ;;  %v54_v11 = vld [vmem:[%s770_s1 + $0xe0] sm:$0xff] }
   0x5   :  { %383 = vmatpush3.msra.mxu1 %v73_v5  ;;  %350 = vmatpush3.msra.mxu0 %v40_v4  ;;  %v71_v12 = vld [vmem:[%s770_s1 + $0x168] sm:$0xff]  ;;  %v38_v13 = vld [vmem:[%s770_s1 + $0x60] sm:$0xff]  ;;  %v53_v15 = vld [vmem:[%s770_s1 + $0xd8] sm:$0xff]  ;;  %v471_v5 = vmov 0.0  }
   0x6   :  { %384 = vmatprep.subr.mxu1 %v88_v7  ;;  %351 = vmatprep.subr.mxu0 %v55_v6  ;;  %v86_v14 = vld [vmem:[%s770_s1 + $0x1e0] sm:$0xff]  ;;  %v37_v17 = vld [vmem:[%s770_s1 + $0x58] sm:$0xff]  ;;  %v52_v19 = vld [vmem:[%s770_s1 + $0xd0] sm:$0xff] }
   0x7   :  { %385 = vmatpush3.msra.mxu1 %v72_v9  ;;  %352 = vmatpush3.msra.mxu0 %v39_v8  ;;  %v70_v16 = vld [vmem:[%s770_s1 + $0x160] sm:$0xff]  ;;  %v85_v18 = vld [vmem:[%s770_s1 + $0x1d8] sm:$0xff]  ;;  %v36_v21 = vld [vmem:[%s770_s1 + $0x50] sm:$0xff] }
   0x8   :  { %386 = vmatprep.subr.mxu1 %v87_v10  ;;  %353 = vmatprep.subr.mxu0 %v54_v11  ;;  %v69_v20 = vld [vmem:[%s770_s1 + $0x158] sm:$0xff]  ;;  %v84_v22 = vld [vmem:[%s770_s1 + $0x1d0] sm:$0xff]  ;;  %v51_v23 = vld [vmem:[%s770_s1 + $0xc8] sm:$0xff] }
   0x9   :  { %387 = vmatpush3.msra.mxu1 %v71_v12  ;;  %354 = vmatpush3.msra.mxu0 %v38_v13  ;;  %v68_v24 = vld [vmem:[%s770_s1 + $0x150] sm:$0xff]  ;;  %v35_v25 = vld [vmem:[%s770_s1 + $0x48] sm:$0xff]  ;;  %v50_v27 = vld [vmem:[%s770_s1 + $0xc0] sm:$0xff] }
   0xa   :  { %388 = vmatprep.subr.mxu1 %v86_v14  ;;  %355 = vmatprep.subr.mxu0 %v53_v15  ;;  %v83_v26 = vld [vmem:[%s770_s1 + $0x1c8] sm:$0xff]  ;;  %v34_v29 = vld [vmem:[%s770_s1 + $0x40] sm:$0xff]  ;;  %v49_v31 = vld [vmem:[%s770_s1 + $0xb8] sm:$0xff] }
   0xb   :  { %389 = vmatpush3.msra.mxu1 %v70_v16  ;;  %356 = vmatpush3.msra.mxu0 %v37_v17  ;;  %v67_v28 = vld [vmem:[%s770_s1 + $0x148] sm:$0xff]  ;;  %v82_v30 = vld [vmem:[%s770_s1 + $0x1c0] sm:$0xff]  ;;  %v33_v33 = vld [vmem:[%s770_s1 + $0x38] sm:$0xff] }
   0xc   :  { %390 = vmatprep.subr.mxu1 %v85_v18  ;;  %357 = vmatprep.subr.mxu0 %v52_v19  ;;  %v66_v32 = vld [vmem:[%s770_s1 + $0x140] sm:$0xff]  ;;  %v81_v34 = vld [vmem:[%s770_s1 + $0x1b8] sm:$0xff]  ;;  %v48_v35 = vld [vmem:[%s770_s1 + $0xb0] sm:$0xff] }
   0xd   :  { %391 = vmatpush3.msra.mxu1 %v69_v20  ;;  %358 = vmatpush3.msra.mxu0 %v36_v21  ;;  %v65_v36 = vld [vmem:[%s770_s1 + $0x138] sm:$0xff]  ;;  %v32_v37 = vld [vmem:[%s770_s1 + $0x30] sm:$0xff]  ;;  %v47_v39 = vld [vmem:[%s770_s1 + $0xa8] sm:$0xff] }
   0xe   :  { %392 = vmatprep.subr.mxu1 %v84_v22  ;;  %359 = vmatprep.subr.mxu0 %v51_v23  ;;  %v80_v38 = vld [vmem:[%s770_s1 + $0x1b0] sm:$0xff]  ;;  %v31_v41 = vld [vmem:[%s770_s1 + $0x28] sm:$0xff]  ;;  %v46_v43 = vld [vmem:[%s770_s1 + $0xa0] sm:$0xff] }
   0xf   :  { %393 = vmatpush3.msra.mxu1 %v68_v24  ;;  %360 = vmatpush3.msra.mxu0 %v35_v25  ;;  %v64_v40 = vld [vmem:[%s770_s1 + $0x130] sm:$0xff]  ;;  %v79_v42 = vld [vmem:[%s770_s1 + $0x1a8] sm:$0xff]  ;;  %v30_v45 = vld [vmem:[%s770_s1 + $0x20] sm:$0xff] }
  0x10   :  { %394 = vmatprep.subr.mxu1 %v83_v26  ;;  %361 = vmatprep.subr.mxu0 %v50_v27  ;;  %v63_v44 = vld [vmem:[%s770_s1 + $0x128] sm:$0xff]  ;;  %v78_v46 = vld [vmem:[%s770_s1 + $0x1a0] sm:$0xff]  ;;  %v45_v47 = vld [vmem:[%s770_s1 + $0x98] sm:$0xff] }
  0x11   :  { %395 = vmatpush3.msra.mxu1 %v67_v28  ;;  %362 = vmatpush3.msra.mxu0 %v34_v29  ;;  %v62_v48 = vld [vmem:[%s770_s1 + $0x120] sm:$0xff]  ;;  %v29_v49 = vld [vmem:[%s770_s1 + $0x18] sm:$0xff]  ;;  %v44_v51 = vld [vmem:[%s770_s1 + $0x90] sm:$0xff] }
  0x12   :  { %396 = vmatprep.subr.mxu1 %v82_v30  ;;  %363 = vmatprep.subr.mxu0 %v49_v31  ;;  %v77_v50 = vld [vmem:[%s770_s1 + $0x198] sm:$0xff]  ;;  %v28_v53 = vld [vmem:[%s770_s1 + $0x10] sm:$0xff]  ;;  %v43_v55 = vld [vmem:[%s770_s1 + $0x88] sm:$0xff] }
  0x13   :  { %397 = vmatpush3.msra.mxu1 %v66_v32  ;;  %364 = vmatpush3.msra.mxu0 %v33_v33  ;;  %v61_v52 = vld [vmem:[%s770_s1 + $0x118] sm:$0xff]  ;;  %v76_v54 = vld [vmem:[%s770_s1 + $0x190] sm:$0xff]  ;;  %v27_v57 = vld [vmem:[%s770_s1 + $0x8] sm:$0xff] }
  0x14   :  { %398 = vmatprep.subr.mxu1 %v81_v34  ;;  %365 = vmatprep.subr.mxu0 %v48_v35  ;;  %v60_v56 = vld [vmem:[%s770_s1 + $0x110] sm:$0xff]  ;;  %v75_v58 = vld [vmem:[%s770_s1 + $0x188] sm:$0xff]  ;;  %v42_v59 = vld [vmem:[%s770_s1 + $0x80] sm:$0xff] }
  0x15   :  { %399 = vmatpush3.msra.mxu1 %v65_v36  ;;  %366 = vmatpush3.msra.mxu0 %v32_v37  ;;  %v22_v60 = vld [vmem:[%s771_s0 + $0x8] sm:$0xff]  ;;  %v26_v61 = vld [vmem:[%s770_s1] sm:$0xff]  ;;  %v24_v2 = vld [vmem:[%s771_s0 + $0x18] sm:$0xff] }
  0x16   :  { %400 = vmatprep.subr.mxu1 %v80_v38  ;;  %367 = vmatprep.subr.mxu0 %v47_v39  ;;  %v59_v62 = vld [vmem:[%s770_s1 + $0x108] sm:$0xff]  ;;  %v21_v63 = vld [vmem:[%s771_s0] sm:$0xff]  ;;  %v105_v3 = vld [vmem:[%s770_s1 + $0x278] sm:$0xff]  ;;  %v337_v38 = vstv %s774_s4 }
  0x17   :  { %401 = vmatpush3.msra.mxu1 %v64_v40  ;;  %368 = vmatpush3.msra.mxu0 %v31_v41  ;;  %v74_v0 = vld [vmem:[%s770_s1 + $0x180] sm:$0xff]  ;;  %v23_v4 = vld [vmem:[%s771_s0 + $0x10] sm:$0xff]  ;;  %v103_v7 = vld [vmem:[%s770_s1 + $0x268] sm:$0xff] }
  0x18   :  { %402 = vmatprep.subr.mxu1 %v79_v42  ;;  %369 = vmatprep.subr.mxu0 %v46_v43  ;;  %v58_v1 = vld [vmem:[%s770_s1 + $0x100] sm:$0xff]  ;;  %v104_v6 = vld [vmem:[%s770_s1 + $0x270] sm:$0xff]  ;;  %v101_v9 = vld [vmem:[%s770_s1 + $0x258] sm:$0xff] }
  0x19   :  { %403 = vmatpush3.msra.mxu1 %v63_v44  ;;  %370 = vmatpush3.msra.mxu0 %v30_v45  ;;  %v102_v8 = vld [vmem:[%s770_s1 + $0x260] sm:$0xff]  ;;  %v100_v10 = vld [vmem:[%s770_s1 + $0x250] sm:$0xff]  ;;  %v99_v11 = vld [vmem:[%s770_s1 + $0x248] sm:$0xff] }
  0x1a   :  { %404 = vmatprep.subr.mxu1 %v78_v46  ;;  %371 = vmatprep.subr.mxu0 %v45_v47  ;;  %v98_v12 = vld [vmem:[%s770_s1 + $0x240] sm:$0xff]  ;;  %v97_v13 = vld [vmem:[%s770_s1 + $0x238] sm:$0xff]  ;;  %v96_v14 = vld [vmem:[%s770_s1 + $0x230] sm:$0xff] }
  0x1b   :  { %405 = vmatpush3.msra.mxu1 %v62_v48  ;;  %372 = vmatpush3.msra.mxu0 %v29_v49  ;;  %v95_v15 = vld [vmem:[%s770_s1 + $0x228] sm:$0xff]  ;;  %v94_v16 = vld [vmem:[%s770_s1 + $0x220] sm:$0xff]  ;;  %v93_v17 = vld [vmem:[%s770_s1 + $0x218] sm:$0xff] }
  0x1c   :  { %406 = vmatprep.subr.mxu1 %v77_v50  ;;  %373 = vmatprep.subr.mxu0 %v44_v51  ;;  %v92_v18 = vld [vmem:[%s770_s1 + $0x210] sm:$0xff]  ;;  %v91_v19 = vld [vmem:[%s770_s1 + $0x208] sm:$0xff]  ;;  %v90_v20 = vld [vmem:[%s770_s1 + $0x200] sm:$0xff] }
  0x1d   :  { %407 = vmatpush3.msra.mxu1 %v61_v52  ;;  %374 = vmatpush3.msra.mxu0 %v28_v53  ;;  %v25_v21 = vld [vmem:[%s771_s0 + $0x20] sm:$0xff] }
  0x1e   :  { %408 = vmatprep.subr.mxu1 %v76_v54  ;;  %375 = vmatprep.subr.mxu0 %v43_v55  ;;  %v345_v26 = vld [vmem:[%s772_s2] ss:$0 sm:$0xff] }
  0x1f   :  { %409 = vmatpush3.msra.mxu1 %v60_v56  ;;  %376 = vmatpush3.msra.mxu0 %v27_v57  ;;  %v346_v34 = vld [vmem:[%s773_s3] ss:$0 sm:$0xff] }
  0x20   :  { %410 = vmatprep.subr.mxu1 %v75_v58  ;;  %377 = vmatprep.subr.mxu0 %v42_v59 }
  0x21   :  { %177 = vmatprep.mubr.f32.mxu0 %v22_v60  ;;  %378 = vmatpush3.msra.mxu0 %v26_v61 }
  0x22   :  { %411 = vmatpush3.msra.mxu1 %v59_v62  ;;  %178 = vmatmul.mubr.f32.vlgmr.msra.gmra.mxu0 %v21_v63 }
  0x23   :  { %412 = vmatprep.subr.mxu1 %v74_v0  ;;  %434 = vmatprep.subr.mxu0 %v471_v5 }
  0x24   :  { %413 = vmatpush3.msra.mxu1 %v58_v1  ;;  %247 = vmatprep.mubr.f32.mxu1 %v24_v2 }
  0x25   :  { %435 = vmatpush3.msra.mxu0 %v105_v3  ;;  %248 = vmatmul.mubr.f32.vlgmr.msra.gmra.mxu1 %v23_v4 }
  0x26   :  { %436 = vmatprep.subr.mxu0 %v471_v5  ;;  %466 = vmatprep.mubr.msk.f32.mxu0 %vm472_vm0, %v471_v5 }
  0x27   :  { %437 = vmatpush3.msra.mxu0 %v104_v6 }
  0x28   :  { %438 = vmatprep.subr.mxu0 %v471_v5 }
  0x29   :  { %439 = vmatpush3.msra.mxu0 %v103_v7 }
  0x2a   :  { %440 = vmatprep.subr.mxu0 %v471_v5 }
  0x2b   :  { %441 = vmatpush3.msra.mxu0 %v102_v8 }
  0x2c   :  { %442 = vmatprep.subr.mxu0 %v471_v5 }
  0x2d   :  { %443 = vmatpush3.msra.mxu0 %v101_v9 }
  0x2e   :  { %444 = vmatprep.subr.mxu0 %v471_v5 }
  0x2f   :  { %445 = vmatpush3.msra.mxu0 %v100_v10 }
  0x30   :  { %446 = vmatprep.subr.mxu0 %v471_v5 }
  0x31   :  { %447 = vmatpush3.msra.mxu0 %v99_v11 }
  0x32   :  { %448 = vmatprep.subr.mxu0 %v471_v5 }
  0x33   :  { %449 = vmatpush3.msra.mxu0 %v98_v12 }
  0x34   :  { %450 = vmatprep.subr.mxu0 %v471_v5 }
  0x35   :  { %451 = vmatpush3.msra.mxu0 %v97_v13 }
  0x36   :  { %452 = vmatprep.subr.mxu0 %v471_v5 }
  0x37   :  { %453 = vmatpush3.msra.mxu0 %v96_v14 }
  0x38   :  { %454 = vmatprep.subr.mxu0 %v471_v5 }
  0x39   :  { %455 = vmatpush3.msra.mxu0 %v95_v15 }
  0x3a   :  { %456 = vmatprep.subr.mxu0 %v471_v5 }
  0x3b   :  { %457 = vmatpush3.msra.mxu0 %v94_v16 }
  0x3c   :  { %458 = vmatprep.subr.mxu0 %v471_v5 }
  0x3d   :  { %459 = vmatpush3.msra.mxu0 %v93_v17 }
  0x3e   :  { %460 = vmatprep.subr.mxu0 %v471_v5 }
  0x3f   :  { %461 = vmatpush3.msra.mxu0 %v92_v18 }
  0x40   :  { %462 = vmatprep.subr.mxu0 %v471_v5 }
  0x41   :  { %463 = vmatpush3.msra.mxu0 %v91_v19 }
  0x42   :  { %464 = vmatprep.subr.mxu0 %v471_v5 }
  0x43   :  { %465 = vmatpush3.msra.mxu0 %v90_v20 }
  0x44   :  { %467 = vmatmul.mubr.f32.vlgmr.msra.gmra.mxu0 %v25_v21 }
  0xe2   :  { %v379_v22 = vpop.f32.mrf.mxu0 }
  0xe4   :  { %v380_v23 = vpop.f32.mrf.mxu0 }
  0xe5   :  { %v414_v24 = vpop.f32.mrf.mxu1  ;;  %v381_v25 = vadd.f32 %v380_v23, %v379_v22 }
  0xe7   :  { %v415_v27 = vpop.f32.mrf.mxu1  ;;  %v180_v28 = vadd.f32 %v381_v25, %v345_v26 }
  0xe8   :  { %v416_v29 = vadd.f32 %v415_v27, %v414_v24 }
  0xea   :  { %v250_v30 = vadd.f32 %v416_v29, %v180_v28 }
 0x104   :  { %v319_v31 = vpop.f32.mrf.mxu0 }
 0x105   :  { %v320_v32 = vadd.f32 %v319_v31, %v250_v30 }
 0x106   :  { %v468_v33 = vpop.f32.mrf.mxu0 }
 0x107   :  { %v323_v35 = vmax.f32 %v320_v32, 0.0 }
 0x109   :  { %v331_v36 = vmul.f32 %v346_v34, %v323_v35 }
 0x10b   :  { %v333_v37 = vsel %vm332_vm1, %v331_v36, 0.0 }
 0x10c   :  { %334 = vadd.xlane.f32.xlu0 %v333_v37 }
 0x195   :  { %v335_v39 = vpop.xlane.xlu0 %334 }
 0x196   :  { %v338_v40 = vadd.f32 %v337_v38, %v335_v39 }
 0x198   :  { %340 = vst.msk [vmem:[%s775_s5] sm:$0xff] %vm339_vm2, %v338_v40 }

</bundles_post_ra>
